<compile_context>
chip_gen: v7x
topology: tpu7x:2x2x1
jax: 0.10.0
libtpu: 0.0.40
codegen_flags: <defaults>
</compile_context>

<pallas_src>
import functools
import math

import numpy as np
import jax
import jax.numpy as jnp
from jax.experimental import pallas as pl
from jax.experimental.pallas import tpu as pltpu

N_HID = 32
PROTO_K = 3
LANE = 128

ETYPES_DD = [
    ('drug', 'contraindication', 'disease'),
    ('drug', 'indication', 'disease'),
    ('drug', 'off-label use', 'disease'),
    ('disease', 'rev_contraindication', 'drug'),
    ('disease', 'rev_indication', 'drug'),
    ('disease', 'rev_off-label use', 'drug'),
]
ETYPES_ALL = ETYPES_DD + [
    ('gene/protein', 'protein_protein', 'gene/protein'),
    ('disease', 'disease_disease', 'disease'),
    ('drug', 'drug_protein', 'gene/protein'),
    ('gene/protein', 'disease_protein', 'disease'),
]


def _round_up(x, m):
    return ((x + m - 1) // m) * m


# ----------------------------- Pallas kernels ------------------------------

def _distmult_kernel(apply_sigmoid, rel_ref, hu_ref, hr_ref, hv_ref, score_ref):
    # rel_ref: scalar-prefetch per-block relation ids (used only by index_maps).
    del rel_ref
    hu = hu_ref[...].astype(jnp.float32)                 # [D, TE]  (bf16 -> f32)
    hv = hv_ref[...].astype(jnp.float32)                 # [D, TE]
    hr = hr_ref[0]                                       # [D, 1]   f32
    s = jnp.sum(hu * hr * hv, axis=0, keepdims=True)     # [1, TE]  lane-dense
    if apply_sigmoid:
        s = jax.nn.sigmoid(s)                            # EUP slot, hidden
    score_ref[...] = s


def distmult_score_fused(hu_t, hv_t, w3, rel_blocks, edge_tile, apply_sigmoid):
    """Fused DistMult over all etypes.

    hu_t, hv_t: [D, E_pad] bf16 (edges on lanes); w3: [n_rel, D, 1] f32;
    rel_blocks: [n_blocks] int32 relation id per edge block.
    Returns [E_pad] f32 scores.
    """
    D, E_pad = hu_t.shape
    n_blocks = E_pad // edge_tile
    grid_spec = pltpu.PrefetchScalarGridSpec(
        num_scalar_prefetch=1,
        grid=(n_blocks,),
        in_specs=[
            pl.BlockSpec((D, edge_tile), lambda i, rel: (0, i)),
            pl.BlockSpec((1, D, 1), lambda i, rel: (rel[i], 0, 0)),
            pl.BlockSpec((D, edge_tile), lambda i, rel: (0, i)),
        ],
        out_specs=pl.BlockSpec((1, edge_tile), lambda i, rel: (0, i)),
    )
    out = pl.pallas_call(
        functools.partial(_distmult_kernel, apply_sigmoid),
        out_shape=jax.ShapeDtypeStruct((1, E_pad), jnp.float32),
        grid_spec=grid_spec,
        compiler_params=pltpu.CompilerParams(
            dimension_semantics=("parallel",),
            vmem_limit_bytes=32 * 1024 * 1024),
    )(rel_blocks, hu_t, w3, hv_t)
    return out[0]


def _proto_kernel(q_ref, emb_ref, coef_ref, wq_ref, wo_ref, b_ref, out_ref):
    # q: [D, TQ]; emb: [K, D, TQ]; coef: [K, 1, TQ]; wq/wo: [D, 1]; b: [1, 1]
    coef = coef_ref[...]
    denom = jnp.maximum(jnp.sum(jnp.abs(coef), axis=0, keepdims=True), 1e-12)
    coef = coef / denom                                   # F.normalize(p=1, dim=1)
    agg = jnp.sum(emb_ref[...] * coef, axis=0)            # [D, TQ]
    q = q_ref[...]                                        # [D, TQ]
    logit = (jnp.sum(q * wq_ref[...], axis=0, keepdims=True)
             + jnp.sum(agg * wo_ref[...], axis=0, keepdims=True)
             + b_ref[...])                                # W_gate(cat(q, agg))
    gate = jax.nn.sigmoid(logit)                          # self.m(...)
    out_ref[...] = (1.0 - gate) * q + gate * agg          # agg_measure='learn'


def proto_aggregate(q_t, emb, coef, wq_t, wo_t, b, query_tile):
    """q_t: [D, NQp] f32; emb: [K, D, NQp]; coef: [K, 1, NQp];
    wq_t/wo_t: [D, 1]; b: [1, 1]. Returns proto embeddings [D, NQp] f32."""
    D, NQ = q_t.shape
    K = emb.shape[0]
    n_blocks = NQ // query_tile
    grid_spec = pltpu.PrefetchScalarGridSpec(
        num_scalar_prefetch=0,
        grid=(n_blocks,),
        in_specs=[
            pl.BlockSpec((D, query_tile), lambda i: (0, i)),
            pl.BlockSpec((K, D, query_tile), lambda i: (0, 0, i)),
            pl.BlockSpec((K, 1, query_tile), lambda i: (0, 0, i)),
            pl.BlockSpec((D, 1), lambda i: (0, 0)),
            pl.BlockSpec((D, 1), lambda i: (0, 0)),
            pl.BlockSpec((1, 1), lambda i: (0, 0)),
        ],
        out_specs=pl.BlockSpec((D, query_tile), lambda i: (0, i)),
    )
    return pl.pallas_call(
        _proto_kernel,
        out_shape=jax.ShapeDtypeStruct((D, NQ), jnp.float32),
        grid_spec=grid_spec,
        compiler_params=pltpu.CompilerParams(
            dimension_semantics=("parallel",),
            vmem_limit_bytes=32 * 1024 * 1024),
    )(q_t, emb, coef, wq_t, wo_t, b)


# ------------------------------ JAX "module" -------------------------------

class DistMultPredictorJAX:
    """proto=True, sim_measure='all_nodes_profile', agg_measure='learn'."""

    def __init__(self, n_hid, num_disease, key, k=PROTO_K):
        self.n_hid = n_hid
        self.k = k
        self.rel2idx = {et: i for i, et in enumerate(ETYPES_ALL)}
        k1, k2, k3 = jax.random.split(key, 3)
        # w_rels relation table, kept both as [n_rel, D] and in kernel layout.
        self.W = jax.random.normal(k1, (len(ETYPES_ALL), n_hid), jnp.float32) * 0.1
        self.W3 = self.W[:, :, None]                       # [n_rel, D, 1]
        # W_gate['disease'] : Linear(2*n_hid, 1), xavier_uniform_, zero bias.
        limit = math.sqrt(6.0 / (2 * n_hid + 1))
        self.W_gate_w = jax.random.uniform(
            k2, (1, 2 * n_hid), jnp.float32, minval=-limit, maxval=limit)
        self.W_gate_b = jnp.zeros((1,), jnp.float32)
        self.wq_t = self.W_gate_w[:, :n_hid].T             # [D, 1]
        self.wo_t = self.W_gate_w[:, n_hid:].T             # [D, 1]
        self.b = self.W_gate_b.reshape(1, 1)
        # TODO(synk): DGL degree/graph-walk disease-profile construction
        # (obtain_disease_profile / sim_matrix) has no Pallas equivalent; a
        # deterministic synthetic cosine-similarity matrix stands in.
        profiles = jax.random.normal(k3, (num_disease, 16), jnp.float32)
        pn = profiles / jnp.linalg.norm(profiles, axis=1, keepdims=True)
        self.sim_all = pn @ pn.T

    # ---------------- one-time host-side metadata (NOT in the hot path) -----
    def prepare(self, edges, edge_tile=None, query_tile=None):
        """Build static, padded index metadata so forward() is pure-jnp."""
        k = self.k
        etypes = [et for et in ETYPES_ALL
                  if et in edges and len(np.asarray(edges[et][0])) > 0]
        max_e = max(len(np.asarray(edges[et][0])) for et in etypes)
        if edge_tile is None:
            edge_tile = min(2048, _round_up(max_e, LANE))
        meta = {'edge_tile': edge_tile, 'etypes': etypes, 'per_etype': {}}

        # Proto (drug-disease) metadata, batched across all DD etypes.
        sim_all_np = np.asarray(self.sim_all)
        q_ids_list, nbr_ids_list, coef_list = [], [], []
        dd_info, offset = {}, 0
        for et in etypes:
            if et not in ETYPES_DD:
                continue
            src_t, _, dst_t = et
            s_idx = np.asarray(edges[et][0])
            d_idx = np.asarray(edges[et][1])
            dis_idx = s_idx if src_t == 'disease' else d_idx
            query_ids = np.unique(dis_idx)                 # == key ids (graph == G)
            pos = np.searchsorted(query_ids, dis_idx)
            sim = sim_all_np[query_ids][:, query_ids]
            vals, idxs = jax.lax.top_k(jnp.asarray(sim), k + 1)
            vals, idxs = np.asarray(vals), np.asarray(idxs)
            coef = vals[:, 1:]                             # drop self-match column
            nbr_global = query_ids[idxs[:, 1:]]            # [Nq, K] disease node ids
            dd_info[et] = {'edge_pos': (offset + pos).astype(np.int32),
                           'dis_is_src': src_t == 'disease'}
            q_ids_list.append(query_ids)
            nbr_ids_list.append(nbr_global)
            coef_list.append(coef)
            offset += len(query_ids)

        nq_total = offset
        nq_pad = _round_up(max(nq_total, 1), LANE)
        if query_tile is None:
            query_tile = min(512, nq_pad)
        meta['nq_total'] = nq_total
        meta['nq_pad'] = nq_pad
        meta['query_tile'] = query_tile
        if nq_total > 0:
            q_ids = np.concatenate(q_ids_list)
            nbr = np.concatenate(nbr_ids_list, axis=0)     # [Nq, K]
            coef = np.concatenate(coef_list, axis=0)       # [Nq, K]
            q_ids_pad = np.zeros((nq_pad,), np.int32)
            q_ids_pad[:nq_total] = q_ids
            nbr_pad = np.zeros((k, nq_pad), np.int32)
            nbr_pad[:, :nq_total] = nbr.T
            coef_pad = np.zeros((k, 1, nq_pad), np.float32)
            coef_pad[:, 0, :nq_total] = coef.T
            meta['proto_query_ids'] = jnp.asarray(q_ids_pad)
            meta['proto_nbr_ids'] = jnp.asarray(nbr_pad)
            meta['proto_coef'] = jnp.asarray(coef_pad)

        # Fused-DistMult segment layout: each etype padded to a tile multiple
        # so every edge block has a single relation id (scalar-prefetched).
        seg_start = 0
        rel_blocks = []
        for et in etypes:
            src_t, _, dst_t = et
            s_idx = np.asarray(edges[et][0]).astype(np.int32)
            d_idx = np.asarray(edges[et][1]).astype(np.int32)
            e = len(s_idx)
            e_pad = _round_up(e, edge_tile)
            pad = e_pad - e
            info = {
                'src_t': src_t, 'dst_t': dst_t, 'n_edges': e,
                'seg_start': seg_start, 'e_pad': e_pad,
                'src_idx': jnp.asarray(np.concatenate([s_idx, np.zeros(pad, np.int32)])),
                'dst_idx': jnp.asarray(np.concatenate([d_idx, np.zeros(pad, np.int32)])),
            }
            if et in dd_info:
                ep = dd_info[et]['edge_pos']
                info['proto_pos'] = jnp.asarray(
                    np.concatenate([ep, np.zeros(pad, np.int32)]))
                info['dis_is_src'] = dd_info[et]['dis_is_src']
            meta['per_etype'][et] = info
            rel_blocks += [self.rel2idx[et]] * (e_pad // edge_tile)
            seg_start += e_pad
        meta['e_pad_total'] = seg_start
        meta['rel_blocks'] = jnp.asarray(np.asarray(rel_blocks, np.int32))
        return meta

    # ---------------- hot path: pure jnp + two pallas_calls -----------------
    def forward(self, h, meta, pretrain_mode):
        edge_tile = meta['edge_tile']
        # Node tables once in [D, N] kernel layout; bf16 for the mem-bound
        # scoring path (f32 accumulation happens inside the kernel).
        hT = {nt: h[nt].T for nt in h}
        hT_bf = {nt: v.astype(jnp.bfloat16) for nt, v in hT.items()}

        proto_bf = None
        if (not pretrain_mode) and meta['nq_total'] > 0:
            q_t = jnp.take(hT['disease'], meta['proto_query_ids'], axis=1)
            emb = jnp.stack(
                [jnp.take(hT['disease'], meta['proto_nbr_ids'][kk], axis=1)
                 for kk in range(self.k)], axis=0)          # [K, D, NQp]
            proto_t = proto_aggregate(q_t, emb, meta['proto_coef'],
                                      self.wq_t, self.wo_t, self.b,
                                      meta['query_tile'])   # [D, NQp]
            proto_bf = proto_t.astype(jnp.bfloat16)

        hu_segs, hv_segs = [], []
        for et in meta['etypes']:
            info = meta['per_etype'][et]
            hu = jnp.take(hT_bf[info['src_t']], info['src_idx'], axis=1)
            hv = jnp.take(hT_bf[info['dst_t']], info['dst_idx'], axis=1)
            if (not pretrain_mode) and ('proto_pos' in info):
                # Gather proto embeddings for the disease endpoints directly —
                # no full disease-table scatter / re-gather.
                dis = jnp.take(proto_bf, info['proto_pos'], axis=1)
                if info['dis_is_src']:
                    hu = dis
                else:
                    hv = dis
            hu_segs.append(hu)
            hv_segs.append(hv)
        hu_t = jnp.concatenate(hu_segs, axis=1)             # [D, E_pad_total]
        hv_t = jnp.concatenate(hv_segs, axis=1)

        flat = distmult_score_fused(hu_t, hv_t, self.W3, meta['rel_blocks'],
                                    edge_tile, apply_sigmoid=pretrain_mode)

        scores, s_l = {}, []
        for et in meta['etypes']:
            info = meta['per_etype'][et]
            s = flat[info['seg_start']:info['seg_start'] + info['n_edges']]
            scores[et] = s
            s_l.append(s)
        return scores, jnp.concatenate(s_l)


# -------------------- pure-JAX reference (sanity check) --------------------

def _reference_forward(model, edges, h, pretrain_mode):
    h_bf = {nt: h[nt].astype(jnp.bfloat16).astype(jnp.float32) for nt in h}
    scores = {}
    for et in ETYPES_ALL:
        src_t, _, dst_t = et
        s_idx = jnp.asarray(np.asarray(edges[et][0], np.int32))
        d_idx = jnp.asarray(np.asarray(edges[et][1], np.int32))
        hh = dict(h_bf)
        if (not pretrain_mode) and (et in ETYPES_DD):
            dis_idx = s_idx if src_t == 'disease' else d_idx
            qids = jnp.asarray(np.unique(np.asarray(dis_idx)))
            q = h['disease'][qids]
            sim = model.sim_all[qids][:, qids]
            vals, idxs = jax.lax.top_k(sim, model.k + 1)
            coef = vals[:, 1:]
            coef = coef / jnp.maximum(jnp.sum(jnp.abs(coef), 1, keepdims=True), 1e-12)
            embed = h['disease'][qids][idxs[:, 1:]]
            agg = jnp.sum(embed * coef[:, :, None], axis=1)
            gate = jax.nn.sigmoid(q @ model.W_gate_w[:, :model.n_hid].T
                                  + agg @ model.W_gate_w[:, model.n_hid:].T
                                  + model.W_gate_b)
            proto = (1.0 - gate) * q + gate * agg
            hh['disease'] = h_bf['disease'].at[qids].set(
                proto.astype(jnp.bfloat16).astype(jnp.float32))
        hu, hv = hh[src_t][s_idx], hh[dst_t][d_idx]
        hr = model.W[model.rel2idx[et]]
        s = jnp.sum(hu * hr * hv, axis=1)
        if pretrain_mode:
            s = jax.nn.sigmoid(s)
        scores[et] = s
    return scores


# ------------------------------- demo driver -------------------------------

def make_edges(etype_idx, n_src, n_dst, n_edges=8):
    e = np.arange(n_edges)
    src = (e + etype_idx) % n_src
    dst = (e * 3 + 2 * etype_idx + 1) % n_dst
    return src.astype(np.int32), dst.astype(np.int32)


if __name__ == "__main__":
    key = jax.random.PRNGKey(0)
    k_h, k_model = jax.random.split(key)
    kd, kdr, kg = jax.random.split(k_h, 3)

    n_nodes = {'drug': 8, 'disease': 8, 'gene/protein': 8}
    h = {
        'disease': jax.random.normal(kd, (n_nodes['disease'], N_HID), jnp.float32),
        'drug': jax.random.normal(kdr, (n_nodes['drug'], N_HID), jnp.float32),
        'gene/protein': jax.random.normal(kg, (n_nodes['gene/protein'], N_HID),
                                          jnp.float32),
    }
    edges = {}
    for i, et in enumerate(ETYPES_ALL):
        s_t, _, d_t = et
        edges[et] = make_edges(i, n_nodes[s_t], n_nodes[d_t], n_edges=8)

    model = DistMultPredictorJAX(N_HID, n_nodes['disease'], k_model)
    meta = model.prepare(edges)

    # finetune-style forward (proto aggregation + raw DistMult scores)
    scores_ft, s_l_ft = model.forward(h, meta, pretrain_mode=False)
    # pretrain-style forward (sigmoid(DistMult) per etype)
    scores_pt, s_l_pt = model.forward(h, meta, pretrain_mode=True)
    jax.block_until_ready((s_l_ft, s_l_pt))

    # sanity check vs. pure-JAX reference (same bf16-rounded edge inputs)
    ref_ft = _reference_forward(model, edges, h, pretrain_mode=False)
    ref_pt = _reference_forward(model, edges, h, pretrain_mode=True)
    for et in scores_ft:
        assert jnp.allclose(scores_ft[et], ref_ft[et], atol=5e-2, rtol=5e-2), et
    for et in scores_pt:
        assert jnp.allclose(scores_pt[et], ref_pt[et], atol=5e-2, rtol=5e-2), et

    print("KERNEL_OK")
</pallas_src>

<mosaic_0001>
module attributes {stable_mosaic.version = 11 : i64} {
  func.func @_proto_kernel(%arg0: i32, %arg1: memref<32x128xf32, #tpu.memory_space<vmem>>, %arg2: memref<3x32x128xf32, #tpu.memory_space<vmem>>, %arg3: memref<3x1x128xf32, #tpu.memory_space<vmem>>, %arg4: memref<32x1xf32, #tpu.memory_space<vmem>>, %arg5: memref<32x1xf32, #tpu.memory_space<vmem>>, %arg6: memref<1x1xf32, #tpu.memory_space<vmem>>, %arg7: memref<32x128xf32, #tpu.memory_space<vmem>>) attributes {dimension_semantics = [#tpu.dimension_semantics<parallel>], iteration_bounds = array<i64: 1>, scalar_prefetch = 0 : i64, scratch_operands = 0 : i64, tpu.core_type = #tpu.core_type<tc>, window_params = [{transform_indices = @transform_0, window_bounds = array<i64: 32, 128>}, {transform_indices = @transform_1, window_bounds = array<i64: 3, 32, 128>}, {transform_indices = @transform_2, window_bounds = array<i64: 3, 1, 128>}, {pipeline_mode = #tpu.pipeline_mode<synchronous>, transform_indices = @transform_3, window_bounds = array<i64: 32, 1>}, {pipeline_mode = #tpu.pipeline_mode<synchronous>, transform_indices = @transform_4, window_bounds = array<i64: 32, 1>}, {pipeline_mode = #tpu.pipeline_mode<synchronous>, transform_indices = @transform_5, window_bounds = array<i64: 1, 1>}, {transform_indices = @transform_6, window_bounds = array<i64: 32, 128>}]} {
    %c0 = arith.constant 0 : index
    %c0_0 = arith.constant 0 : index
    %c0_1 = arith.constant 0 : index
    %0 = vector.load %arg3[%c0, %c0_0, %c0_1] : memref<3x1x128xf32, #tpu.memory_space<vmem>>, vector<3x1x128xf32>
    %1 = math.absf %0 : vector<3x1x128xf32>
    %cst = arith.constant dense<0.000000e+00> : vector<1x128xf32>
    %2 = vector.multi_reduction <add>, %1, %cst [0] : vector<3x1x128xf32> to vector<1x128xf32>
    %3 = vector.shape_cast %2 : vector<1x128xf32> to vector<1x1x128xf32>
    %cst_2 = arith.constant 9.99999996E-13 : f32
    %4 = vector.broadcast %cst_2 : f32 to vector<1x1x128xf32>
    %5 = arith.maximumf %3, %4 : vector<1x1x128xf32>
    %6 = vector.broadcast %5 : vector<1x1x128xf32> to vector<3x1x128xf32>
    %7 = arith.divf %0, %6 : vector<3x1x128xf32>
    %c0_3 = arith.constant 0 : index
    %c0_4 = arith.constant 0 : index
    %c0_5 = arith.constant 0 : index
    %8 = vector.load %arg2[%c0_3, %c0_4, %c0_5] : memref<3x32x128xf32, #tpu.memory_space<vmem>>, vector<3x32x128xf32>
    %9 = vector.broadcast %7 : vector<3x1x128xf32> to vector<3x32x128xf32>
    %10 = arith.mulf %8, %9 : vector<3x32x128xf32>
    %cst_6 = arith.constant dense<0.000000e+00> : vector<32x128xf32>
    %11 = vector.multi_reduction <add>, %10, %cst_6 [0] : vector<3x32x128xf32> to vector<32x128xf32>
    %c0_7 = arith.constant 0 : index
    %c0_8 = arith.constant 0 : index
    %12 = vector.load %arg1[%c0_7, %c0_8] : memref<32x128xf32, #tpu.memory_space<vmem>>, vector<32x128xf32>
    %c0_9 = arith.constant 0 : index
    %c0_10 = arith.constant 0 : index
    %13 = vector.load %arg4[%c0_9, %c0_10] : memref<32x1xf32, #tpu.memory_space<vmem>>, vector<32x1xf32>
    %14 = vector.broadcast %13 : vector<32x1xf32> to vector<32x128xf32>
    %15 = arith.mulf %12, %14 : vector<32x128xf32>
    %cst_11 = arith.constant dense<0.000000e+00> : vector<128xf32>
    %16 = vector.multi_reduction <add>, %15, %cst_11 [0] : vector<32x128xf32> to vector<128xf32>
    %17 = vector.shape_cast %16 : vector<128xf32> to vector<1x128xf32>
    %c0_12 = arith.constant 0 : index
    %c0_13 = arith.constant 0 : index
    %18 = vector.load %arg5[%c0_12, %c0_13] : memref<32x1xf32, #tpu.memory_space<vmem>>, vector<32x1xf32>
    %19 = vector.broadcast %18 : vector<32x1xf32> to vector<32x128xf32>
    %20 = arith.mulf %11, %19 : vector<32x128xf32>
    %cst_14 = arith.constant dense<0.000000e+00> : vector<128xf32>
    %21 = vector.multi_reduction <add>, %20, %cst_14 [0] : vector<32x128xf32> to vector<128xf32>
    %22 = vector.shape_cast %21 : vector<128xf32> to vector<1x128xf32>
    %23 = arith.addf %17, %22 : vector<1x128xf32>
    %c0_15 = arith.constant 0 : index
    %c0_16 = arith.constant 0 : index
    %24 = vector.load %arg6[%c0_15, %c0_16] : memref<1x1xf32, #tpu.memory_space<vmem>>, vector<1x1xf32>
    %25 = vector.broadcast %24 : vector<1x1xf32> to vector<1x128xf32>
    %26 = arith.addf %23, %25 : vector<1x128xf32>
    %27 = arith.negf %26 : vector<1x128xf32>
    %28 = math.exp %27 : vector<1x128xf32>
    %cst_17 = arith.constant 1.000000e+00 : f32
    %29 = vector.broadcast %cst_17 : f32 to vector<1x128xf32>
    %30 = arith.addf %29, %28 : vector<1x128xf32>
    %31 = arith.divf %29, %30 : vector<1x128xf32>
    %cst_18 = arith.constant 1.000000e+00 : f32
    %32 = vector.broadcast %cst_18 : f32 to vector<1x128xf32>
    %33 = arith.subf %32, %31 : vector<1x128xf32>
    %34 = vector.broadcast %33 : vector<1x128xf32> to vector<32x128xf32>
    %35 = arith.mulf %34, %12 : vector<32x128xf32>
    %36 = vector.broadcast %31 : vector<1x128xf32> to vector<32x128xf32>
    %37 = arith.mulf %36, %11 : vector<32x128xf32>
    %38 = arith.addf %35, %37 : vector<32x128xf32>
    %c0_19 = arith.constant 0 : index
    %c0_20 = arith.constant 0 : index
    %39 = vector.load %arg7[%c0_19, %c0_20] : memref<32x128xf32, #tpu.memory_space<vmem>>, vector<32x128xf32>
    tpu.vector_store %arg7[%c0_19, %c0_20], %38 {strides = array<i32>} : memref<32x128xf32, #tpu.memory_space<vmem>>, vector<32x128xf32>,
    return
  }
  func.func @transform_0(%arg0: i32) -> (i32, i32) {
    %c0_i32 = arith.constant 0 : i32
    %c0_i32_0 = arith.constant 0 : i32
    return %c0_i32, %arg0 : i32, i32
  }
  func.func @transform_1(%arg0: i32) -> (i32, i32, i32) {
    %c0_i32 = arith.constant 0 : i32
    %c0_i32_0 = arith.constant 0 : i32
    %c0_i32_1 = arith.constant 0 : i32
    return %c0_i32, %c0_i32_0, %arg0 : i32, i32, i32
  }
  func.func @transform_2(%arg0: i32) -> (i32, i32, i32) {
    %c0_i32 = arith.constant 0 : i32
    %c0_i32_0 = arith.constant 0 : i32
    %c0_i32_1 = arith.constant 0 : i32
    return %c0_i32, %c0_i32_0, %arg0 : i32, i32, i32
  }
  func.func @transform_3(%arg0: i32) -> (i32, i32) {
    %c0_i32 = arith.constant 0 : i32
    %c0_i32_0 = arith.constant 0 : i32
    %c0_i32_1 = arith.constant 0 : i32
    return %c0_i32, %c0_i32_0 : i32, i32
  }
  func.func @transform_4(%arg0: i32) -> (i32, i32) {
    %c0_i32 = arith.constant 0 : i32
    %c0_i32_0 = arith.constant 0 : i32
    %c0_i32_1 = arith.constant 0 : i32
    return %c0_i32, %c0_i32_0 : i32, i32
  }
  func.func @transform_5(%arg0: i32) -> (i32, i32) {
    %c0_i32 = arith.constant 0 : i32
    %c0_i32_0 = arith.constant 0 : i32
    %c0_i32_1 = arith.constant 0 : i32
    return %c0_i32, %c0_i32_0 : i32, i32
  }
  func.func @transform_6(%arg0: i32) -> (i32, i32) {
    %c0_i32 = arith.constant 0 : i32
    %c0_i32_0 = arith.constant 0 : i32
    return %c0_i32, %arg0 : i32, i32
  }
}

</mosaic_0001>

<bundles_post_ra>
// kernel: tpu_custom_call.1
= control target key start
LH: loop header
LB: loop body
LE: loop exit
PB: predicated region body
PF: predicated region fallthrough
CT: control target
= control target key end

     0   :  { %s423_s0 = inlined_call_operand.vmem [shape: f32[32,128], index: 0, kind: input, shape index: {}]   ;;  %s424_s1 = inlined_call_operand.hbm [shape: f32[3,32,128], index: 1, kind: input, shape index: {}]   ;;  %s425_s2 = inlined_call_operand.vmem [shape: f32[3,1,128], index: 2, kind: input, shape index: {}]   ;;  %s426_s3 = inlined_call_operand.vmem [shape: f32[32,1], index: 3, kind: input, shape index: {}]   ;;  %s427_s4 = inlined_call_operand.vmem [shape: f32[32,1], index: 4, kind: input, shape index: {}]   ;;  %s428_s5 = inlined_call_operand.<no memory space> [shape: f32[1,1], index: 5, kind: input, shape index: {}]   ;;  %s429_s6 = inlined_call_operand.hbm [shape: f32[32,128], index: 6, kind: output, shape index: {}]  }
   0x1   :  { %v11_v0 = vstv %s428_s5 }
   0x2   :  { %12 = vst [vmem:[#allocation2] sm:$0x1] %v11_v0 }
   0x3   :  { %13 = vsyncpa [#allocation4], 0 }
   0x4   :  { %14 = vsyncpa [#allocation5], 0  ;;  %s299_s23 = smov [#allocation3]   ;;  %s251_s27 = scalar_lea.hbm %s424_s1, 1536 }
   0x5   :  { %s22_s24 = sshll.u32 %s299_s23, 4  ;;  %p252_p0 = scmp.ne.s32.totalorder %s424_s1, %s251_s27  ;;  %s23_s24 = int_to_ptr.vmem [resolvable:$true] %s22_s24 }
   0x6   :  { %p255_p1 = scmp.lt.u32.totalorder %s251_s27, %s424_s1 }
   0x8   :  { %p257_p2 = pnand %p255_p1, %p252_p0 }
   0xa   :  { %260 = shalt.err (!%p257_p2)
}
   0xb   :  { %s261_s5 = scalar_lea.vmem %s23_s24, 1536  ;;  %p266_p4 = scmp.lt.s32.totalorder %s23_s24, %s23_s24 }
   0xc   :  { %p262_p3 = scmp.ne.s32.totalorder %s23_s24, %s261_s5  ;;  %p267_p5 = scmp.lt.s32.totalorder %s261_s5, %s261_s5 }
   0xe   :  { %p268_p6 = por %p267_p5, %p266_p4 }
  0x10   :  { %p269_p7 = pnand %p268_p6, %p262_p3 }
  0x12   :  { %272 = shalt.err (!%p269_p7)
}
  0x13   :  { %s300_s8 = smov 128   ;;  %s301_s9 = smov 8  }
  0x14   :  { %28 = dma.hbm_to_vmem [thread:$0]  %s424_s1, 1536, %s23_s24, [#allocation4], %s300_s8, %s300_s8, %s301_s9  }
  0x15   :  { %295 = dma.done.wait [#allocation4], 1536  }
  0x16   :  { %296 = vsyncadd [#allocation4], 4294965760  ;;  %v302_v1 = vmov 0   ;;  %v148_v2 = vld [vmem:[%s427_s4] sm:$0xff]  ;;  %v149_v4 = vld [vmem:[%s427_s4 + $0x8] sm:$0xff]  ;;  %vm46_vm0 = vcmask 1040384   ;;  %v72_v23 = vlaneseq }
  0x17   :  { %244 = vset.pattern.permute.xlu1 %v302_v1  ;;  %243 = vset.pattern.permute.xlu0 %v302_v1  ;;  %v111_v3 = vld [vmem:[%s426_s3] sm:$0xff]  ;;  %v112_v5 = vld [vmem:[%s426_s3 + $0x8] sm:$0xff]  ;;  %v150_v6 = vld [vmem:[%s427_s4 + $0x10] sm:$0xff] }
  0x18   :  { %154 = vperm.xlu1 %244, %v148_v2   ;;  %117 = vperm.xlu0 %243, %v111_v3   ;;  %v113_v7 = vld [vmem:[%s426_s3 + $0x10] sm:$0xff]  ;;  %v151_v8 = vld [vmem:[%s427_s4 + $0x18] sm:$0xff]  ;;  %v186_v10 = vld [vmem:[#allocation2] sm:$0x1]  ;;  %v73_v24 = vshrl.u32 %v72_v23, 7 }
  0x19   :  { %v114_v9 = vld [vmem:[%s426_s3 + $0x18] sm:$0xff]  ;;  %v40_v11 = vld [vmem:[%s425_s2] sm:$0x1]  ;;  %v41_v12 = vld [vmem:[%s425_s2 + $0x1] sm:$0x1] }
  0x1a   :  { %v43_v13 = vand.u32 2147483647, %v40_v11  ;;  %v44_v14 = vand.u32 2147483647, %v41_v12  ;;  %v42_v15 = vld [vmem:[%s425_s2 + $0x2] sm:$0x1] }
  0x1b   :  { %v45_v16 = vand.u32 2147483647, %v42_v15  ;;  %v390_v26 = vsub.s32 0, %v73_v24  ;;  %v58_v30 = vld [vmem:[#allocation3 + $0x8] sm:$0xff]  ;;  %v57_v32 = vld [vmem:[#allocation3] sm:$0xff]  ;;  %v59_v36 = vld [vmem:[#allocation3 + $0x10] sm:$0xff] }
  0x1c   :  { %159 = vperm.xlu1 %244, %v149_v4   ;;  %122 = vperm.xlu0 %243, %v112_v5   ;;  %v47_v17 = vsel %vm46_vm0, %v43_v13, 0.0  ;;  %v48_v18 = vsel %vm46_vm0, %v44_v14, 0.0  ;;  %v62_v31 = vld [vmem:[#allocation3 + $0x28] sm:$0xff]  ;;  %v61_v35 = vld [vmem:[#allocation3 + $0x20] sm:$0xff]  ;;  %v63_v37 = vld [vmem:[#allocation3 + $0x30] sm:$0xff] }
  0x1d   :  { %v49_v19 = vadd.f32 %v48_v18, %v47_v17  ;;  %v50_v20 = vsel %vm46_vm0, %v45_v16, 0.0  ;;  %v66_v41 = vld [vmem:[#allocation3 + $0x48] sm:$0xff]  ;;  %v60_v46 = vld [vmem:[#allocation3 + $0x18] sm:$0xff]  ;;  %v65_v48 = vld [vmem:[#allocation3 + $0x40] sm:$0xff] }
  0x1e   :  { %v64_v47 = vld [vmem:[#allocation3 + $0x38] sm:$0xff]  ;;  %v67_v49 = vld [vmem:[#allocation3 + $0x50] sm:$0xff]  ;;  %v108_v0 = vld [vmem:[%s423_s0 + $0x8] sm:$0xff] }
  0x1f   :  { %v51_v21 = vadd.f32 %v50_v20, %v49_v19  ;;  %v68_v60 = vld [vmem:[#allocation3 + $0x58] sm:$0xff] }
  0x20   :  { %164 = vperm.xlu1 %244, %v150_v6   ;;  %127 = vperm.xlu0 %243, %v113_v7   ;;  %v107_v5 = vld [vmem:[%s423_s0] sm:$0xff]  ;;  %v109_v6 = vld [vmem:[%s423_s0 + $0x10] sm:$0xff]  ;;  %v110_v16 = vld [vmem:[%s423_s0 + $0x18] sm:$0xff]  ;;  %s303_s0 = smov [#allocation6]  }
  0x21   :  { %v52_v22 = vmax.f32 %v51_v21, 1e-12  ;;  %s225_s15 = sshll.u32 %s303_s0, 4  ;;  %s226_s15 = int_to_ptr.vmem [resolvable:$true] %s225_s15 }
  0x22   :  { %s273_s16 = scalar_lea.vmem %s226_s15, 512  ;;  %p278_p9 = scmp.lt.s32.totalorder %s226_s15, %s226_s15 }
  0x23   :  { %245 = vrcp.f32 %v52_v22  ;;  %p274_p8 = scmp.ne.s32.totalorder %s226_s15, %s273_s16  ;;  %p279_p10 = scmp.lt.s32.totalorder %s273_s16, %s273_s16 }
  0x24   :  { %169 = vperm.xlu1 %244, %v151_v8   ;;  %132 = vperm.xlu0 %243, %v114_v9  }
  0x25   :  { %p280_p11 = por %p279_p10, %p278_p9 }
  0x27   :  { %p281_p12 = pnand %p280_p11, %p274_p8 }
  0x28   :  { %189 = vperm.xlu0 %243, %v186_v10  }
  0x2d   :  { %v246_v25 = vpop.eup %245 }
  0x2e   :  { %v54_v27 = vmul.f32 %v246_v25, %v40_v11  ;;  %v55_v28 = vmul.f32 %v246_v25, %v41_v12  ;;  %v56_v29 = vmul.f32 %v246_v25, %v42_v15 }
  0x30   :  { %v75_v33 = vrot.slane %v54_v27, %v390_v26  ;;  %v79_v34 = vrot.slane %v55_v28, %v390_v26  ;;  %v83_v40 = vrot.slane %v56_v29, %v390_v26 }
  0x32   :  { %v88_v38 = vmul.f32 %v75_v33, %v58_v30  ;;  %v92_v39 = vmul.f32 %v79_v34, %v62_v31  ;;  %v87_v42 = vmul.f32 %v75_v33, %v57_v32  ;;  %v91_v43 = vmul.f32 %v79_v34, %v61_v35 }
  0x33   :  { %v89_v44 = vmul.f32 %v75_v33, %v59_v36  ;;  %v93_v45 = vmul.f32 %v79_v34, %v63_v37  ;;  %v96_v50 = vmul.f32 %v83_v40, %v66_v41  ;;  %v90_v54 = vmul.f32 %v75_v33, %v60_v46 }
  0x34   :  { %v101_v51 = vadd.f32 %v92_v39, %v88_v38  ;;  %v94_v55 = vmul.f32 %v79_v34, %v64_v47  ;;  %v95_v56 = vmul.f32 %v83_v40, %v65_v48  ;;  %v99_v57 = vadd.f32 %v91_v43, %v87_v42 }
  0x35   :  { %v97_v58 = vmul.f32 %v83_v40, %v67_v49  ;;  %v103_v59 = vadd.f32 %v93_v45, %v89_v44  ;;  %v98_v1 = vmul.f32 %v83_v40, %v68_v60 }
  0x36   :  { %v102_v61 = vadd.f32 %v101_v51, %v96_v50  ;;  %v105_v2 = vadd.f32 %v94_v55, %v90_v54  ;;  %v100_v3 = vadd.f32 %v99_v57, %v95_v56 }
  0x37   :  { %v104_v4 = vadd.f32 %v103_v59, %v97_v58 }
  0x38   :  { %v106_v11 = vadd.f32 %v105_v2, %v98_v1 }
  0x97   :  { %v155_v52 = vpop.permute.xlu1 %154  ;;  %v118_v53 = vpop.permute.xlu0 %117 }
  0x98   :  { %v172_v12 = vmul.f32 %v155_v52, %v100_v3  ;;  %v135_v13 = vmul.f32 %v118_v53, %v107_v5 }
  0x9b   :  { %v160_v62 = vpop.permute.xlu1 %159  ;;  %v123_v63 = vpop.permute.xlu0 %122 }
  0x9c   :  { %v173_v7 = vmul.f32 %v160_v62, %v102_v61  ;;  %v136_v8 = vmul.f32 %v123_v63, %v108_v0 }
  0x9e   :  { %v176_v17 = vadd.f32 %v173_v7, %v172_v12  ;;  %v139_v18 = vadd.f32 %v136_v8, %v135_v13 }
  0x9f   :  { %v165_v9 = vpop.permute.xlu1 %164  ;;  %v128_v10 = vpop.permute.xlu0 %127 }
  0xa0   :  { %v174_v14 = vmul.f32 %v165_v9, %v104_v4  ;;  %v137_v15 = vmul.f32 %v128_v10, %v109_v6 }
  0xa2   :  { %v177_v21 = vadd.f32 %v176_v17, %v174_v14  ;;  %v140_v22 = vadd.f32 %v139_v18, %v137_v15 }
  0xa3   :  { %v170_v19 = vpop.permute.xlu1 %169  ;;  %v133_v20 = vpop.permute.xlu0 %132 }
  0xa4   :  { %v175_v23 = vmul.f32 %v170_v19, %v106_v11  ;;  %v138_v24 = vmul.f32 %v133_v20, %v110_v16 }
  0xa6   :  { %v178_v25 = vadd.f32 %v177_v21, %v175_v23  ;;  %v141_v27 = vadd.f32 %v140_v22, %v138_v24 }
  0xa7   :  { %v190_v38 = vpop.permute.xlu0 %189 }
  0xa8   :  { %v179_v28 = vrot.slane %v178_v25, 4  ;;  %v142_v29 = vrot.slane %v141_v27, 4  ;;  %v195_v42 = vrot.slane %v190_v38, %v390_v26 }
  0xaa   :  { %v180_v30 = vadd.f32 %v179_v28, %v178_v25  ;;  %v143_v31 = vadd.f32 %v142_v29, %v141_v27 }
  0xac   :  { %v181_v32 = vrot.slane %v180_v30, 2  ;;  %v144_v33 = vrot.slane %v143_v31, 2 }
  0xae   :  { %v182_v34 = vadd.f32 %v181_v32, %v180_v30  ;;  %v145_v35 = vadd.f32 %v144_v33, %v143_v31 }
  0xb0   :  { %v146_v36 = vrot.slane %v145_v35, 1  ;;  %v183_v37 = vrot.slane %v182_v34, 1 }
  0xb2   :  { %v147_v39 = vadd.f32 %v146_v36, %v145_v35  ;;  %v184_v40 = vadd.f32 %v183_v37, %v182_v34 }
  0xb4   :  { %v185_v41 = vadd.f32 %v184_v40, %v147_v39 }
  0xb6   :  { %v196_v43 = vadd.f32 %v195_v42, %v185_v41 }
  0xb8   :  { %v237_v44 = vmul.f32 -1.442695, %v196_v43 }
  0xba   :  { %247 = vpow2.f32 %v237_v44 }
  0xc4   :  { %v248_v45 = vpop.eup %247 }
  0xc5   :  { %v200_v46 = vadd.f32 1.0, %v248_v45 }
  0xc7   :  { %249 = vrcp.f32 %v200_v46 }
  0xd1   :  { %v250_v47 = vpop.eup %249 }
  0xd2   :  { %v203_v48 = vsub.f32 1.0, %v250_v47  ;;  %v208_v49 = vmul.f32 %v250_v47, %v100_v3  ;;  %v209_v50 = vmul.f32 %v250_v47, %v102_v61  ;;  %v210_v51 = vmul.f32 %v250_v47, %v104_v4 }
  0xd3   :  { %v211_v52 = vmul.f32 %v250_v47, %v106_v11 }
  0xd4   :  { %v204_v53 = vmul.f32 %v203_v48, %v107_v5  ;;  %v205_v54 = vmul.f32 %v203_v48, %v108_v0  ;;  %v206_v55 = vmul.f32 %v203_v48, %v109_v6  ;;  %v207_v56 = vmul.f32 %v203_v48, %v110_v16 }
  0xd6   :  { %v212_v57 = vadd.f32 %v208_v49, %v204_v53  ;;  %v213_v26 = vadd.f32 %v209_v50, %v205_v54  ;;  %v214_v58 = vadd.f32 %v210_v51, %v206_v55  ;;  %v215_v59 = vadd.f32 %v211_v52, %v207_v56 }
  0xd8   :  { %216 = vst [vmem:[#allocation6] sm:$0xff] %v212_v57  ;;  %217 = vst [vmem:[#allocation6 + $0x8] sm:$0xff] %v213_v26 }
  0xd9   :  { %218 = vst [vmem:[#allocation6 + $0x10] sm:$0xff] %v214_v58  ;;  %219 = vst [vmem:[#allocation6 + $0x18] sm:$0xff] %v215_v59 }
  0xda   :  { %284 = shalt.err (!%p281_p12)
}
  0xdb   :  { %s285_s18 = scalar_lea.hbm %s429_s6, 512 }
  0xdc   :  { %p286_p13 = scmp.ne.s32.totalorder %s429_s6, %s285_s18  ;;  %p289_p0 = scmp.lt.u32.totalorder %s285_s18, %s429_s6 }
  0xde   :  { %p291_p1 = pnand %p289_p0, %p286_p13 }
  0xe0   :  { %294 = shalt.err (!%p291_p1)
}
  0xe1   :  { %231 = dma.vmem_to_hbm [thread:$0]  %s226_s15, 512, %s429_s6, [#allocation5], %s300_s8, %s300_s8, %s301_s9  }
  0xe2   :  { %297 = dma.done.wait [#allocation5], 512  }
  0xe3   :  { %298 = vsyncadd [#allocation5], 4294966784 }
  0xe4   :  { %235 = vsyncpa [#allocation4], 1 }
  0xe5   :  { %236 = vsyncpa [#allocation5], 1 }

</bundles_post_ra>
